<compile_context>
chip_gen: v7x
topology: tpu7x:2x2x1
jax: 0.10.0
libtpu: 0.0.40
codegen_flags: <defaults>
</compile_context>

<pallas_src>
import functools
import math

import jax
import jax.numpy as jnp
from jax.experimental import pallas as pl
from jax.experimental.pallas import tpu as pltpu

LANE = 128  # TPU lane width


def _round_up(n: int, m: int) -> int:
    return ((n + m - 1) // m) * m


def _actor_kernel(x_ref, w1_ref, b1_ref, w2_ref, b2_ref, w3_ref, b3_ref,
                  out_ref, *, out_dim: int):
    # x tile (TB, input_dim) f32 -> cast to bf16 in-kernel (no wrapper pass).
    x = x_ref[...].astype(jnp.bfloat16)
    h1 = jnp.dot(x, w1_ref[...], preferred_element_type=jnp.float32) + b1_ref[...]
    h1 = jnp.maximum(h1, 0.0)
    h2 = jnp.dot(h1.astype(jnp.bfloat16), w2_ref[...],
                 preferred_element_type=jnp.float32) + b2_ref[...]
    h2 = jnp.maximum(h2, 0.0)
    logits = jnp.dot(h2.astype(jnp.bfloat16), w3_ref[...],
                     preferred_element_type=jnp.float32) + b3_ref[...]

    # Mask the zero-padded output lanes so they get exactly zero probability.
    lane = jax.lax.broadcasted_iota(jnp.int32, logits.shape, 1)
    logits = jnp.where(lane < out_dim, logits, -jnp.inf)

    # Numerically stable softmax (f32 epilogue, exact normalization).
    m = jnp.max(logits, axis=-1, keepdims=True)
    e = jnp.exp(logits - m)
    denom = jnp.sum(e, axis=-1, keepdims=True)
    out_ref[...] = (e / denom).astype(out_ref.dtype)


def init_actor_params(key, input_dim, hidden_dim, output_dim):
    """Kaiming-uniform (a=0, relu) weights, zero biases — matches _initialize_weights.

    Weights are stored transposed, i.e. (in_features, out_features), so the
    kernel computes x @ W + b directly.
    """
    dims = [input_dim, hidden_dim[0], hidden_dim[1], output_dim]
    params = []
    for i in range(3):
        fan_in, fan_out = dims[i], dims[i + 1]
        key, sub = jax.random.split(key)
        bound = math.sqrt(2.0) * math.sqrt(3.0 / fan_in)  # gain * sqrt(3 / fan_in)
        w = jax.random.uniform(sub, (fan_in, fan_out), jnp.float32, -bound, bound)
        b = jnp.zeros((1, fan_out), jnp.float32)
        params += [w, b]
    return tuple(params)


def prepare_params(params):
    """Pad weights/biases to lane multiples and cast weights (MXU inputs) to bf16.

    w1 keeps its REAL input dim (so x needs no feature padding); w2/w3 input
    dims are padded to match the lane-padded hidden activations.  Biases stay
    f32 (added after f32 accumulation)."""
    w1, b1, w2, b2, w3, b3 = params

    def pad_w(w, pad_in):
        i, o = w.shape
        ip = _round_up(i, LANE) if pad_in else i
        wp = jnp.zeros((ip, _round_up(o, LANE)), jnp.float32)
        return wp.at[:i, :o].set(w).astype(jnp.bfloat16)

    def pad_b(b):
        o = b.shape[-1]
        return jnp.zeros((1, _round_up(o, LANE)), jnp.float32).at[:, :o].set(b)

    return (pad_w(w1, False), pad_b(b1),
            pad_w(w2, True), pad_b(b2),
            pad_w(w3, True), pad_b(b3))


def actor_forward(x, padded_params, output_dim, *, block_b=1024,
                  out_dtype=jnp.bfloat16):
    """Returns Categorical probs, shape (B, output_dim) (squeezed if B == 1)."""
    w1, b1, w2, b2, w3, b3 = padded_params
    B, in_dim = x.shape
    assert in_dim == w1.shape[0]
    OUT_P = w3.shape[1]

    # Balanced batch tiling (no wrapper-side batch padding; trailing partial
    # blocks are handled by Pallas with masked output stores).
    n_tiles = pl.cdiv(B, block_b)
    if B >= 32:
        n_tiles = max(n_tiles, 2)  # keep both v7x TensorCores busy
    if n_tiles == 1:
        TB = B                     # full-dim block: always layout-legal
    else:
        TB = _round_up(pl.cdiv(B, n_tiles), 16)  # bf16 sublane multiple
        n_tiles = pl.cdiv(B, TB)

    const = lambda shape: pl.BlockSpec(shape, lambda i: (0, 0))

    flops = 2 * B * (w1.shape[0] * w1.shape[1]
                     + w2.shape[0] * w2.shape[1]
                     + w3.shape[0] * w3.shape[1])
    bytes_accessed = int(
        x.size * x.dtype.itemsize
        + sum(int(p.size) * p.dtype.itemsize for p in padded_params)
        + B * OUT_P * jnp.dtype(out_dtype).itemsize)

    probs = pl.pallas_call(
        functools.partial(_actor_kernel, out_dim=output_dim),
        out_shape=jax.ShapeDtypeStruct((B, OUT_P), out_dtype),
        grid=(n_tiles,),
        in_specs=[
            pl.BlockSpec((TB, in_dim), lambda i: (i, 0)),  # x: tiled over batch
            const(w1.shape), const(b1.shape),              # weights/biases resident
            const(w2.shape), const(b2.shape),
            const(w3.shape), const(b3.shape),
        ],
        out_specs=pl.BlockSpec((TB, OUT_P), lambda i: (i, 0)),
        compiler_params=pltpu.CompilerParams(
            dimension_semantics=("parallel",),  # megacore sharding on v7x
        ),
        cost_estimate=pl.CostEstimate(flops=flops,
                                      transcendentals=B * OUT_P,
                                      bytes_accessed=bytes_accessed),
    )(x, w1, b1, w2, b2, w3, b3)

    # Drop lane padding.  TODO(synk): in production, consume the padded bf16
    # slab directly (e.g. in the sampler) to avoid this extra slice pass.
    probs = probs[:, :output_dim]
    # torch forward does .squeeze(0); only has an effect when batch dim is 1.
    if B == 1:
        probs = jnp.squeeze(probs, axis=0)
    return probs


if __name__ == "__main__":
    key = jax.random.PRNGKey(0)

    batch = 2
    input_dim = 16
    hidden_dim = (32, 32)
    output_dim = 8

    pkey, xkey, x2key = jax.random.split(key, 3)
    params = init_actor_params(pkey, input_dim, hidden_dim, output_dim)
    padded_params = prepare_params(params)

    def ref_fwd(xx):
        w1, b1, w2, b2, w3, b3 = params
        h1 = jax.nn.relu(xx @ w1 + b1)
        h2 = jax.nn.relu(h1 @ w2 + b2)
        return jax.nn.softmax(h2 @ w3 + b3, axis=-1)

    # Small-batch path (single full-dim block).
    x = jax.random.normal(xkey, (batch, input_dim), jnp.float32)
    probs = jax.block_until_ready(actor_forward(x, padded_params, output_dim))
    assert probs.shape == (batch, output_dim)
    p32 = probs.astype(jnp.float32)
    assert bool(jnp.all(jnp.abs(jnp.sum(p32, axis=-1) - 1.0) < 1e-2))
    assert bool(jnp.all(jnp.abs(p32 - ref_fwd(x)) < 6e-2))  # bf16 matmuls

    # Multi-tile path (>=2 grid steps for v7x megacore + partial trailing block).
    x2 = jax.random.normal(x2key, (40, input_dim), jnp.float32)
    probs2 = jax.block_until_ready(actor_forward(x2, padded_params, output_dim))
    assert probs2.shape == (40, output_dim)
    p2 = probs2.astype(jnp.float32)
    assert bool(jnp.all(jnp.abs(jnp.sum(p2, axis=-1) - 1.0) < 1e-2))
    assert bool(jnp.all(jnp.abs(p2 - ref_fwd(x2)) < 6e-2))

    print("KERNEL_OK")
</pallas_src>

<mosaic_0001>
module attributes {stable_mosaic.version = 11 : i64} {
  func.func @_actor_kernel(%arg0: i32, %arg1: memref<2x16xf32, #tpu.memory_space<vmem>>, %arg2: memref<16x128xbf16, #tpu.memory_space<vmem>>, %arg3: memref<1x128xf32, #tpu.memory_space<vmem>>, %arg4: memref<128x128xbf16, #tpu.memory_space<vmem>>, %arg5: memref<1x128xf32, #tpu.memory_space<vmem>>, %arg6: memref<128x128xbf16, #tpu.memory_space<vmem>>, %arg7: memref<1x128xf32, #tpu.memory_space<vmem>>, %arg8: memref<2x128xbf16, #tpu.memory_space<vmem>>) attributes {dimension_semantics = [#tpu.dimension_semantics<parallel>], iteration_bounds = array<i64: 1>, scalar_prefetch = 0 : i64, scratch_operands = 0 : i64, tpu.core_type = #tpu.core_type<tc>, window_params = [{transform_indices = @transform_0, window_bounds = array<i64: 2, 16>}, {pipeline_mode = #tpu.pipeline_mode<synchronous>, transform_indices = @transform_1, window_bounds = array<i64: 16, 128>}, {pipeline_mode = #tpu.pipeline_mode<synchronous>, transform_indices = @transform_2, window_bounds = array<i64: 1, 128>}, {pipeline_mode = #tpu.pipeline_mode<synchronous>, transform_indices = @transform_3, window_bounds = array<i64: 128, 128>}, {pipeline_mode = #tpu.pipeline_mode<synchronous>, transform_indices = @transform_4, window_bounds = array<i64: 1, 128>}, {pipeline_mode = #tpu.pipeline_mode<synchronous>, transform_indices = @transform_5, window_bounds = array<i64: 128, 128>}, {pipeline_mode = #tpu.pipeline_mode<synchronous>, transform_indices = @transform_6, window_bounds = array<i64: 1, 128>}, {transform_indices = @transform_7, window_bounds = array<i64: 2, 128>}]} {
    %c0 = arith.constant 0 : index
    %c0_0 = arith.constant 0 : index
    %0 = vector.load %arg1[%c0, %c0_0] : memref<2x16xf32, #tpu.memory_space<vmem>>, vector<2x16xf32>
    %1 = arith.truncf %0 : vector<2x16xf32> to vector<2x16xbf16>
    %c0_1 = arith.constant 0 : index
    %c0_2 = arith.constant 0 : index
    %2 = vector.load %arg2[%c0_1, %c0_2] : memref<16x128xbf16, #tpu.memory_space<vmem>>, vector<16x128xbf16>
    %cst = arith.constant dense<0.000000e+00> : vector<2x128xf32>
    %3 = tpu.matmul %1, %2, %cst {dimension_numbers = #tpu.dot_dimension_numbers<[1], [0], [0], [1], [0, 0, 1, 1], [], []>} : vector<2x16xbf16>, vector<16x128xbf16>, vector<2x128xf32> -> vector<2x128xf32>
    %c0_3 = arith.constant 0 : index
    %c0_4 = arith.constant 0 : index
    %4 = vector.load %arg3[%c0_3, %c0_4] : memref<1x128xf32, #tpu.memory_space<vmem>>, vector<1x128xf32>
    %5 = vector.broadcast %4 : vector<1x128xf32> to vector<2x128xf32>
    %6 = arith.addf %3, %5 : vector<2x128xf32>
    %cst_5 = arith.constant 0.000000e+00 : f32
    %7 = vector.broadcast %cst_5 : f32 to vector<2x128xf32>
    %8 = arith.maximumf %6, %7 : vector<2x128xf32>
    %9 = arith.truncf %8 : vector<2x128xf32> to vector<2x128xbf16>
    %c0_6 = arith.constant 0 : index
    %c0_7 = arith.constant 0 : index
    %10 = vector.load %arg4[%c0_6, %c0_7] : memref<128x128xbf16, #tpu.memory_space<vmem>>, vector<128x128xbf16>
    %cst_8 = arith.constant dense<0.000000e+00> : vector<2x128xf32>
    %11 = tpu.matmul %9, %10, %cst_8 {dimension_numbers = #tpu.dot_dimension_numbers<[1], [0], [0], [1], [0, 0, 1, 1], [], []>} : vector<2x128xbf16>, vector<128x128xbf16>, vector<2x128xf32> -> vector<2x128xf32>
    %c0_9 = arith.constant 0 : index
    %c0_10 = arith.constant 0 : index
    %12 = vector.load %arg5[%c0_9, %c0_10] : memref<1x128xf32, #tpu.memory_space<vmem>>, vector<1x128xf32>
    %13 = vector.broadcast %12 : vector<1x128xf32> to vector<2x128xf32>
    %14 = arith.addf %11, %13 : vector<2x128xf32>
    %cst_11 = arith.constant 0.000000e+00 : f32
    %15 = vector.broadcast %cst_11 : f32 to vector<2x128xf32>
    %16 = arith.maximumf %14, %15 : vector<2x128xf32>
    %17 = arith.truncf %16 : vector<2x128xf32> to vector<2x128xbf16>
    %c0_12 = arith.constant 0 : index
    %c0_13 = arith.constant 0 : index
    %18 = vector.load %arg6[%c0_12, %c0_13] : memref<128x128xbf16, #tpu.memory_space<vmem>>, vector<128x128xbf16>
    %cst_14 = arith.constant dense<0.000000e+00> : vector<2x128xf32>
    %19 = tpu.matmul %17, %18, %cst_14 {dimension_numbers = #tpu.dot_dimension_numbers<[1], [0], [0], [1], [0, 0, 1, 1], [], []>} : vector<2x128xbf16>, vector<128x128xbf16>, vector<2x128xf32> -> vector<2x128xf32>
    %c0_15 = arith.constant 0 : index
    %c0_16 = arith.constant 0 : index
    %20 = vector.load %arg7[%c0_15, %c0_16] : memref<1x128xf32, #tpu.memory_space<vmem>>, vector<1x128xf32>
    %21 = vector.broadcast %20 : vector<1x128xf32> to vector<2x128xf32>
    %22 = arith.addf %19, %21 : vector<2x128xf32>
    %23 = tpu.iota {dimensions = array<i32: 1>} : vector<2x128xi32>
    %c8_i32 = arith.constant 8 : i32
    %24 = vector.broadcast %c8_i32 : i32 to vector<2x128xi32>
    %25 = arith.cmpi slt, %23, %24 : vector<2x128xi32>
    %cst_17 = arith.constant 0xFF800000 : f32
    %26 = vector.broadcast %cst_17 : f32 to vector<2x128xf32>
    %27 = arith.select %25, %22, %26 : vector<2x128xi1>, vector<2x128xf32>
    %cst_18 = arith.constant dense<0xFF800000> : vector<2xf32>
    %28 = vector.multi_reduction <maximumf>, %27, %cst_18 [1] : vector<2x128xf32> to vector<2xf32>
    %29 = vector.shape_cast %28 : vector<2xf32> to vector<2x1xf32>
    %30 = vector.broadcast %29 : vector<2x1xf32> to vector<2x128xf32>
    %31 = arith.subf %27, %30 : vector<2x128xf32>
    %32 = math.exp %31 : vector<2x128xf32>
    %cst_19 = arith.constant dense<0.000000e+00> : vector<2xf32>
    %33 = vector.multi_reduction <add>, %32, %cst_19 [1] : vector<2x128xf32> to vector<2xf32>
    %34 = vector.shape_cast %33 : vector<2xf32> to vector<2x1xf32>
    %35 = vector.broadcast %34 : vector<2x1xf32> to vector<2x128xf32>
    %36 = arith.divf %32, %35 : vector<2x128xf32>
    %37 = arith.truncf %36 : vector<2x128xf32> to vector<2x128xbf16>
    %c0_20 = arith.constant 0 : index
    %c0_21 = arith.constant 0 : index
    %38 = vector.load %arg8[%c0_20, %c0_21] : memref<2x128xbf16, #tpu.memory_space<vmem>>, vector<2x128xbf16>
    tpu.vector_store %arg8[%c0_20, %c0_21], %37 {strides = array<i32>} : memref<2x128xbf16, #tpu.memory_space<vmem>>, vector<2x128xbf16>,
    return
  }
  func.func @transform_0(%arg0: i32) -> (i32, i32) {
    %c0_i32 = arith.constant 0 : i32
    %c0_i32_0 = arith.constant 0 : i32
    return %arg0, %c0_i32 : i32, i32
  }
  func.func @transform_1(%arg0: i32) -> (i32, i32) {
    %c0_i32 = arith.constant 0 : i32
    %c0_i32_0 = arith.constant 0 : i32
    %c0_i32_1 = arith.constant 0 : i32
    return %c0_i32, %c0_i32_0 : i32, i32
  }
  func.func @transform_2(%arg0: i32) -> (i32, i32) {
    %c0_i32 = arith.constant 0 : i32
    %c0_i32_0 = arith.constant 0 : i32
    %c0_i32_1 = arith.constant 0 : i32
    return %c0_i32, %c0_i32_0 : i32, i32
  }
  func.func @transform_3(%arg0: i32) -> (i32, i32) {
    %c0_i32 = arith.constant 0 : i32
    %c0_i32_0 = arith.constant 0 : i32
    %c0_i32_1 = arith.constant 0 : i32
    return %c0_i32, %c0_i32_0 : i32, i32
  }
  func.func @transform_4(%arg0: i32) -> (i32, i32) {
    %c0_i32 = arith.constant 0 : i32
    %c0_i32_0 = arith.constant 0 : i32
    %c0_i32_1 = arith.constant 0 : i32
    return %c0_i32, %c0_i32_0 : i32, i32
  }
  func.func @transform_5(%arg0: i32) -> (i32, i32) {
    %c0_i32 = arith.constant 0 : i32
    %c0_i32_0 = arith.constant 0 : i32
    %c0_i32_1 = arith.constant 0 : i32
    return %c0_i32, %c0_i32_0 : i32, i32
  }
  func.func @transform_6(%arg0: i32) -> (i32, i32) {
    %c0_i32 = arith.constant 0 : i32
    %c0_i32_0 = arith.constant 0 : i32
    %c0_i32_1 = arith.constant 0 : i32
    return %c0_i32, %c0_i32_0 : i32, i32
  }
  func.func @transform_7(%arg0: i32) -> (i32, i32) {
    %c0_i32 = arith.constant 0 : i32
    %c0_i32_0 = arith.constant 0 : i32
    return %arg0, %c0_i32 : i32, i32
  }
}

</mosaic_0001>

<bundles_post_ra>
// kernel: tpu_custom_call.1
= control target key start
LH: loop header
LB: loop body
LE: loop exit
PB: predicated region body
PF: predicated region fallthrough
CT: control target
= control target key end

     0   :  { %12 = vsyncpa [#allocation3], 0  ;;  %s785_s0 = inlined_call_operand.hbm [shape: f32[2,16], index: 0, kind: input, shape index: {}]   ;;  %s786_s1 = inlined_call_operand.hbm [shape: bf16[16,128], index: 1, kind: input, shape index: {}]   ;;  %s787_s2 = inlined_call_operand.vmem [shape: f32[1,128], index: 2, kind: input, shape index: {}]   ;;  %s788_s3 = inlined_call_operand.hbm [shape: bf16[128,128], index: 3, kind: input, shape index: {}]   ;;  %s789_s4 = inlined_call_operand.vmem [shape: f32[1,128], index: 4, kind: input, shape index: {}]   ;;  %s790_s5 = inlined_call_operand.hbm [shape: bf16[128,128], index: 5, kind: input, shape index: {}]   ;;  %s791_s6 = inlined_call_operand.vmem [shape: f32[1,128], index: 6, kind: input, shape index: {}]   ;;  %s792_s7 = inlined_call_operand.hbm [shape: bf16[2,128], index: 7, kind: output, shape index: {}]  }
   0x1   :  { %13 = vsyncpa [#allocation6], 0 }
   0x2   :  { %14 = vsyncpa [#allocation9], 0 }
   0x3   :  { %15 = vsyncpa [#allocation4], 0  ;;  %s638_s24 = smov [#allocation5]   ;;  %s520_s28 = scalar_lea.hbm %s786_s1, 128 }
   0x4   :  { %s31_s25 = sshll.u32 %s638_s24, 4  ;;  %p521_p0 = scmp.ne.s32.totalorder %s786_s1, %s520_s28  ;;  %s32_s25 = int_to_ptr.vmem [resolvable:$true] %s31_s25 }
   0x5   :  { %p524_p1 = scmp.lt.u32.totalorder %s520_s28, %s786_s1 }
   0x7   :  { %p526_p2 = pnand %p524_p1, %p521_p0 }
   0x9   :  { %529 = shalt.err (!%p526_p2)
}
   0xa   :  { %s530_s10 = scalar_lea.vmem %s32_s25, 128  ;;  %p535_p4 = scmp.lt.s32.totalorder %s32_s25, %s32_s25 }
   0xb   :  { %p531_p3 = scmp.ne.s32.totalorder %s32_s25, %s530_s10  ;;  %p536_p5 = scmp.lt.s32.totalorder %s530_s10, %s530_s10 }
   0xd   :  { %p537_p6 = por %p536_p5, %p535_p4 }
   0xf   :  { %p538_p7 = pnand %p537_p6, %p531_p3 }
  0x11   :  { %541 = shalt.err (!%p538_p7)
}
  0x12   :  { %s639_s11 = smov 64   ;;  %s640_s12 = smov 4  }
  0x13   :  { %37 = dma.hbm_to_vmem [thread:$0]  %s786_s1, 128, %s32_s25, [#allocation6], %s639_s11, %s639_s11, %s640_s12  }
  0x14   :  { %s641_s15 = smov [#allocation2]   ;;  %s642_s17 = smov [#allocation7]  }
  0x15   :  { %s22_s16 = sshll.u32 %s641_s15, 4  ;;  %s45_s18 = sshll.u32 %s642_s17, 4  ;;  %s23_s16 = int_to_ptr.vmem [resolvable:$true] %s22_s16  ;;  %s46_s18 = int_to_ptr.vmem [resolvable:$true] %s45_s18 }
  0x16   :  { %s542_s21 = scalar_lea.hbm %s785_s0, 32 }
  0x17   :  { %p543_p8 = scmp.ne.s32.totalorder %s785_s0, %s542_s21  ;;  %p546_p9 = scmp.lt.u32.totalorder %s542_s21, %s785_s0 }
  0x19   :  { %p548_p10 = pnand %p546_p9, %p543_p8 }
  0x1b   :  { %551 = shalt.err (!%p548_p10)
}
  0x1c   :  { %s552_s1 = scalar_lea.vmem %s23_s16, 32  ;;  %p557_p12 = scmp.lt.s32.totalorder %s23_s16, %s23_s16 }
  0x1d   :  { %p553_p11 = scmp.ne.s32.totalorder %s23_s16, %s552_s1  ;;  %p558_p13 = scmp.lt.s32.totalorder %s552_s1, %s552_s1 }
  0x1f   :  { %p559_p0 = por %p558_p13, %p557_p12 }
  0x21   :  { %p560_p1 = pnand %p559_p0, %p553_p11 }
  0x23   :  { %563 = shalt.err (!%p560_p1)
}
  0x24   :  { %25 = dma.hbm_to_vmem [thread:$0]  %s785_s0, 32, %s23_s16, [#allocation3]  }
  0x25   :  { %s564_s30 = scalar_lea.hbm %s788_s3, 1024 }
  0x26   :  { %p565_p2 = scmp.ne.s32.totalorder %s788_s3, %s564_s30  ;;  %p568_p3 = scmp.lt.u32.totalorder %s564_s30, %s788_s3 }
  0x28   :  { %p570_p4 = pnand %p568_p3, %p565_p2 }
  0x2a   :  { %573 = shalt.err (!%p570_p4)
}
  0x2b   :  { %s574_s14 = scalar_lea.vmem %s46_s18, 1024  ;;  %p579_p6 = scmp.lt.s32.totalorder %s46_s18, %s46_s18 }
  0x2c   :  { %p575_p5 = scmp.ne.s32.totalorder %s46_s18, %s574_s14  ;;  %p580_p7 = scmp.lt.s32.totalorder %s574_s14, %s574_s14 }
  0x2e   :  { %p581_p8 = por %p580_p7, %p579_p6 }
  0x30   :  { %p582_p9 = pnand %p581_p8, %p575_p5 }
  0x32   :  { %585 = shalt.err (!%p582_p9)
}
  0x33   :  { %51 = dma.hbm_to_vmem [thread:$0]  %s788_s3, 1024, %s46_s18, [#allocation6], %s639_s11, %s639_s11, %s640_s12  }
  0x34   :  { %s643_s16 = smov [#allocation8]   ;;  %s586_s21 = scalar_lea.hbm %s790_s5, 1024 }
  0x35   :  { %s59_s17 = sshll.u32 %s643_s16, 4  ;;  %p587_p10 = scmp.ne.s32.totalorder %s790_s5, %s586_s21  ;;  %s60_s17 = int_to_ptr.vmem [resolvable:$true] %s59_s17 }
  0x36   :  { %p590_p11 = scmp.lt.u32.totalorder %s586_s21, %s790_s5 }
  0x38   :  { %p592_p12 = pnand %p590_p11, %p587_p10 }
  0x3a   :  { %595 = shalt.err (!%p592_p12)
}
  0x3b   :  { %s596_s1 = scalar_lea.vmem %s60_s17, 1024  ;;  %p601_p0 = scmp.lt.s32.totalorder %s60_s17, %s60_s17 }
  0x3c   :  { %p597_p13 = scmp.ne.s32.totalorder %s60_s17, %s596_s1  ;;  %p602_p1 = scmp.lt.s32.totalorder %s596_s1, %s596_s1 }
  0x3e   :  { %p603_p2 = por %p602_p1, %p601_p0 }
  0x40   :  { %p604_p3 = pnand %p603_p2, %p597_p13 }
  0x42   :  { %607 = shalt.err (!%p604_p3)
}
  0x43   :  { %65 = dma.hbm_to_vmem [thread:$0]  %s790_s5, 1024, %s60_s17, [#allocation9], %s639_s11, %s639_s11, %s640_s12  }
  0x44   :  { %630 = dma.done.wait [#allocation3], 32  }
  0x45   :  { %631 = vsyncadd [#allocation3], 4294967264 }
  0x46   :  { %632 = dma.done.wait [#allocation6], 1152  }
  0x47   :  { %633 = vsyncadd [#allocation6], 4294966144 }
  0x48   :  { %634 = dma.done.wait [#allocation9], 1024  }
  0x49   :  { %635 = vsyncadd [#allocation9], 4294966272  ;;  %v644_v0 = vmov 0.0   ;;  %vm645_vm0 = vmmov 0   ;;  %v499_v1 = vld [vmem:[#allocation5] sm:$0xff]   ;;  %vm98_vm1 = vcmask 130048   ;;  %v368_v36 = vlaneseq }
  0x4a   :  { %444 = vmatprep.subr.bf16.mxu0 %v644_v0  ;;  %446 = vmatprep.mubr.msk.bf16.mxu0 %vm645_vm0, %v644_v0  ;;  %v81_v2 = vld [vmem:[#allocation2] sm:$0x3]  ;;  %v500_v4 = vld [vmem:[#allocation7] sm:$0xff]   ;;  %v501_v5 = vld [vmem:[#allocation7 + $0x8] sm:$0xff]   ;;  %vm372_vm3 = vcmask 1041408  }
  0x4b   :  { %450 = vmatprep.subr.bf16.mxu1 %v644_v0  ;;  %466 = vmatprep.mubr.msk.bf16.mxu1 %vm645_vm0, %v644_v0  ;;  %v82_v3 = vpack.c.bf16 %v81_v2, %v81_v2  ;;  %v502_v6 = vld [vmem:[#allocation7 + $0x10] sm:$0xff]   ;;  %v503_v7 = vld [vmem:[#allocation7 + $0x18] sm:$0xff]   ;;  %v504_v8 = vld [vmem:[#allocation7 + $0x20] sm:$0xff]   ;;  %v369_v37 = vand.u32 127, %v368_v36 }
  0x4c   :  { %445 = vmatpush3.bf16.msra.mxu0 %v499_v1  ;;  %451 = vmatpush3.bf16.msra.mxu1 %v500_v4  ;;  %v505_v9 = vld [vmem:[#allocation7 + $0x28] sm:$0xff]   ;;  %v506_v10 = vld [vmem:[#allocation7 + $0x30] sm:$0xff]   ;;  %v507_v11 = vld [vmem:[#allocation7 + $0x38] sm:$0xff]  }
  0x4d   :  { %470 = vmatprep.subr.bf16.mxu0 %v644_v0  ;;  %452 = vmatprep.subr.bf16.mxu1 %v644_v0  ;;  %v508_v12 = vld [vmem:[#allocation8] sm:$0xff]   ;;  %v509_v13 = vld [vmem:[#allocation8 + $0x8] sm:$0xff]   ;;  %v510_v14 = vld [vmem:[#allocation8 + $0x10] sm:$0xff]   ;;  %vm370_vm2 = vcmp.lt.s32.totalorder %v369_v37, 8 }
  0x4e   :  { %v511_v15 = vld [vmem:[#allocation8 + $0x18] sm:$0xff]   ;;  %v512_v16 = vld [vmem:[#allocation8 + $0x20] sm:$0xff]   ;;  %v513_v17 = vld [vmem:[#allocation8 + $0x28] sm:$0xff]  }
  0x4f   :  { %447 = vmatmul.mubr.msk.bf16.vlgmr.msra.gmra.mrb[0].mxu0 %vm98_vm1, %v82_v3  ;;  %v403_v18 = vld [vmem:[%s787_s2] ss:$0 sm:$0xff]  ;;  %v515_v27 = vld [vmem:[#allocation8 + $0x38] sm:$0xff]  }
  0x50   :  { %486 = vmatprep.mubr.msk.bf16.mxu0 %vm645_vm0, %v644_v0  ;;  %453 = vmatpush3.bf16.msra.mxu1 %v501_v5  ;;  %v514_v26 = vld [vmem:[#allocation8 + $0x30] sm:$0xff]  }
  0x51   :  { %454 = vmatprep.subr.bf16.mxu1 %v644_v0  ;;  %471 = vmatpush3.bf16.msra.mxu0 %v508_v12  ;;  %v406_v28 = vld [vmem:[%s789_s4] ss:$0 sm:$0xff]  ;;  %s646_s4 = smov [#allocation10]  }
  0x52   :  { %472 = vmatprep.subr.bf16.mxu0 %v644_v0  ;;  %v415_v38 = vld [vmem:[%s791_s6] ss:$0 sm:$0xff]  ;;  %s392_s6 = sshll.u32 %s646_s4, 4  ;;  %s393_s6 = int_to_ptr.vmem [resolvable:$true] %s392_s6 }
  0x53   :  { %s608_s28 = scalar_lea.vmem %s393_s6, 16  ;;  %s612_s29 = scalar_lea.vmem %s393_s6, 32 }
  0x54   :  { %455 = vmatpush3.bf16.msra.mxu1 %v502_v6  ;;  %p609_p4 = scmp.ne.s32.totalorder %s393_s6, %s608_s28  ;;  %p613_p5 = scmp.lt.s32.totalorder %s393_s6, %s393_s6 }
  0x55   :  { %456 = vmatprep.subr.bf16.mxu1 %v644_v0  ;;  %473 = vmatpush3.bf16.msra.mxu0 %v509_v13  ;;  %p614_p6 = scmp.lt.s32.totalorder %s612_s29, %s608_s28 }
  0x56   :  { %474 = vmatprep.subr.bf16.mxu0 %v644_v0 }
  0x57   :  { %p615_p7 = por %p614_p6, %p613_p5 }
  0x58   :  { %457 = vmatpush3.bf16.msra.mxu1 %v503_v7 }
  0x59   :  { %458 = vmatprep.subr.bf16.mxu1 %v644_v0  ;;  %475 = vmatpush3.bf16.msra.mxu0 %v510_v14  ;;  %p616_p8 = pnand %p615_p7, %p609_p4 }
  0x5a   :  { %476 = vmatprep.subr.bf16.mxu0 %v644_v0 }
  0x5c   :  { %459 = vmatpush3.bf16.msra.mxu1 %v504_v8 }
  0x5d   :  { %460 = vmatprep.subr.bf16.mxu1 %v644_v0  ;;  %477 = vmatpush3.bf16.msra.mxu0 %v511_v15 }
  0x5e   :  { %478 = vmatprep.subr.bf16.mxu0 %v644_v0 }
  0x60   :  { %461 = vmatpush3.bf16.msra.mxu1 %v505_v9 }
  0x61   :  { %462 = vmatprep.subr.bf16.mxu1 %v644_v0  ;;  %479 = vmatpush3.bf16.msra.mxu0 %v512_v16 }
  0x62   :  { %480 = vmatprep.subr.bf16.mxu0 %v644_v0 }
  0x64   :  { %463 = vmatpush3.bf16.msra.mxu1 %v506_v10 }
  0x65   :  { %464 = vmatprep.subr.bf16.mxu1 %v644_v0  ;;  %481 = vmatpush3.bf16.msra.mxu0 %v513_v17 }
  0x66   :  { %482 = vmatprep.subr.bf16.mxu0 %v644_v0 }
  0x68   :  { %465 = vmatpush3.bf16.msra.mxu1 %v507_v11 }
  0x69   :  { %483 = vmatpush3.bf16.msra.mxu0 %v514_v26 }
  0x6a   :  { %484 = vmatprep.subr.bf16.mxu0 %v644_v0 }
  0x6d   :  { %485 = vmatpush3.bf16.msra.mxu0 %v515_v27 }
 0x122   :  { %v136_v19 = vpop.f32.mrb[0].mxu0 }
 0x123   :  { %v137_v20 = vadd.f32 %v403_v18, %v136_v19  ;;  %v448_v21 = vpop.f32.mrb[1].mxu0 }
 0x124   :  { %v139_v22 = vpop.f32.mrb[2].mxu0 }
 0x125   :  { %v142_v23 = vmax.f32 %v137_v20, 0.0  ;;  %v449_v24 = vpop.f32.mrb[3].mxu0 }
 0x127   :  { %v143_v25 = vpack.c.bf16 %v142_v23, %v142_v23 }
 0x129   :  { %467 = vmatmul.mubr.bf16.vlgmr.msra.gmra.mrb[0].mxu1 %v143_v25 }
 0x1fc   :  { %v249_v29 = vpop.f32.mrb[0].mxu1 }
 0x1fd   :  { %v250_v30 = vadd.f32 %v406_v28, %v249_v29  ;;  %v468_v31 = vpop.f32.mrb[1].mxu1 }
 0x1fe   :  { %v252_v32 = vpop.f32.mrb[2].mxu1 }
 0x1ff   :  { %v255_v33 = vmax.f32 %v250_v30, 0.0  ;;  %v469_v34 = vpop.f32.mrb[3].mxu1 }
 0x201   :  { %v256_v35 = vpack.c.bf16 %v255_v33, %v255_v33 }
 0x203   :  { %487 = vmatmul.mubr.bf16.vlgmr.msra.gmra.mrb[4].mxu0 %v256_v35 }
 0x2d6   :  { %v362_v39 = vpop.f32.mrb[4].mxu0 }
 0x2d7   :  { %v363_v40 = vadd.f32 %v415_v38, %v362_v39  ;;  %v488_v41 = vpop.f32.mrb[5].mxu0 }
 0x2d8   :  { %v365_v42 = vpop.f32.mrb[6].mxu0 }
 0x2d9   :  { %v489_v43 = vpop.f32.mrb[7].mxu0  ;;  %v371_v44 = vsel %vm370_vm2, %v363_v40, -inf }
 0x2da   :  { %v373_v45 = vsel %vm372_vm3, %v371_v44, -inf }
 0x2db   :  { %374 = vmax.xlane.f32.xlu0 %v373_v45 }
 0x368   :  { %v375_v46 = vpop.xlane.xlu0 %374 }
 0x369   :  { %v376_v47 = vsub.f32 %v371_v44, %v375_v46 }
 0x36b   :  { %v377_v48 = vmul.f32 1.442695, %v376_v47 }
 0x36d   :  { %516 = vpow2.f32 %v377_v48 }
 0x377   :  { %v517_v49 = vpop.eup %516 }
 0x378   :  { %v379_v50 = vsel %vm372_vm3, %v517_v49, 0.0 }
 0x379   :  { %380 = vadd.xlane.f32.xlu0 %v379_v50 }
 0x406   :  { %v381_v51 = vpop.xlane.xlu0 %380 }
 0x407   :  { %518 = vrcp.f32 %v381_v51 }
 0x411   :  { %v519_v52 = vpop.eup %518 }
 0x412   :  { %v383_v53 = vmul.f32 %v519_v52, %v517_v49 }
 0x414   :  { %v384_v54 = vpack.c.bf16 %v383_v53, %v383_v53 }
 0x416   :  { %385 = vst [vmem:[#allocation10] sm:$0x1] %v384_v54 }
 0x417   :  { %619 = shalt.err (!%p616_p8)
}
 0x418   :  { %s620_s9 = scalar_lea.hbm %s792_s7, 16 }
 0x419   :  { %p621_p9 = scmp.ne.s32.totalorder %s792_s7, %s620_s9  ;;  %p624_p10 = scmp.lt.u32.totalorder %s620_s9, %s792_s7 }
 0x41b   :  { %p626_p11 = pnand %p624_p10, %p621_p9 }
 0x41d   :  { %629 = shalt.err (!%p626_p11)
}
 0x41e   :  { %395 = dma.vmem_to_hbm [thread:$0]  %s393_s6, 16, %s792_s7, [#allocation4]  }
 0x41f   :  { %636 = dma.done.wait [#allocation4], 16  }
 0x420   :  { %637 = vsyncadd [#allocation4], 4294967280 }
 0x421   :  { %399 = vsyncpa [#allocation3], 1 }
 0x422   :  { %400 = vsyncpa [#allocation6], 1 }
 0x423   :  { %401 = vsyncpa [#allocation9], 1 }
 0x424   :  { %402 = vsyncpa [#allocation4], 1 }

</bundles_post_ra>
